<compile_context>
chip_gen: v7x
topology: tpu7x:2x2x1
jax: 0.10.0
libtpu: 0.0.40
codegen_flags: <defaults>
</compile_context>

<pallas_src>
import functools

import jax
import jax.numpy as jnp
from jax.experimental import pallas as pl
from jax.experimental.pallas import tpu as pltpu


# Per-step x-block byte target: >= 8 MiB keeps this HBM-read-bound kernel near
# the roofline on all of v5e/v6e/v7x (could be raised toward 16 MiB on v6e/v7x).
_X_BLOCK_TARGET = 8 << 20
# v7x has only 64 MiB physical VMEM; cap the scoped limit well below it.
_VMEM_CAP = 48 << 20


def _gap_conv1x1_kernel(x_ref, w_ref, bias_ref, o_ref, acc_ref, *,
                        hw_total, thw, ragged):
    # x_ref:    (TB, C_in, THW)  spatial slice of TB batch elements
    # w_ref:    (C_in, C_out)    1x1 conv weight, pre-folded with BN scale & 1/HW
    # bias_ref: (1, C_out)       folded BN bias = beta - mean * gamma/sqrt(var+eps)
    # o_ref:    (TB, C_out)      pooled -> conv -> bn -> relu result (no spatial)
    # acc_ref:  (TB, C_in) f32   running spatial sum (persists across HW tiles)
    h = pl.program_id(1)

    @pl.when(h == 0)
    def _():
        acc_ref[...] = jnp.zeros_like(acc_ref)

    x = x_ref[...].astype(jnp.float32)
    if ragged:
        # Last HW tile sticks past HW; zero the out-of-range lanes so they do
        # not contribute to the spatial sum (exact: 1/HW is folded into w_ref).
        col = h * thw + jax.lax.broadcasted_iota(jnp.int32, x.shape, 2)
        x = jnp.where(col < hw_total, x, 0.0)
    acc_ref[...] += jnp.sum(x, axis=2)

    @pl.when(h == pl.num_programs(1) - 1)
    def _():
        # (TB, C_in) x (C_in, C_out); mean (1/HW) and BN scale are already in
        # w_ref, so this IS the conv+bn output. Garbage tail-batch rows (cdiv
        # grid) only produce garbage output rows, which Pallas discards.
        y = jnp.dot(acc_ref[...], w_ref[...], preferred_element_type=jnp.float32)
        y = y + bias_ref[...]
        o_ref[...] = jnp.maximum(y, 0.0).astype(o_ref.dtype)


def _round_up(n, m):
    return ((n + m - 1) // m) * m


def _choose_tiles(N, C_in, HW, elem_bytes):
    per_batch = C_in * HW * elem_bytes

    # Batch tile: as many batch elements per step as fit in the block target.
    TB = max(1, min(N, _X_BLOCK_TARGET // max(1, per_batch)))

    # v7x megacore: keep >= 2 steps on the 'parallel' batch axis when there is
    # enough total work for the split to matter (v5e/v6e are single-TC and
    # unaffected). For N == 1 the HW reduction would have to be sharded across
    # cores with partial accumulators instead (not done here).
    if N >= 2 and N * per_batch >= (4 << 20) and pl.cdiv(N, TB) < 2:
        TB = pl.cdiv(N, 2)

    # Spatial tile: only when a (TB, C_in, HW) block exceeds the target. thw is
    # any multiple of 128 (no HW % 128 gate); the ragged tail is masked in the
    # kernel. Keep per-row DMA length >= ~2 KiB so strided copies stream well.
    thw = HW
    if TB * per_batch > _X_BLOCK_TARGET:
        cand = (_X_BLOCK_TARGET // max(1, TB * C_in * elem_bytes)) // 128 * 128
        row_floor = _round_up(max(1, 2048 // elem_bytes), 128)
        cand = max(cand, row_floor, 128)
        if cand < HW:
            thw = cand
    n_hw = pl.cdiv(HW, thw)
    return TB, thw, n_hw


def gap_conv1x1(x_nchw, w, bn_gamma, bn_beta, bn_mean, bn_var, eps=1e-5):
    N, C_in, H, W = x_nchw.shape
    C_out = w.shape[0]
    HW = H * W

    x = x_nchw.reshape(N, C_in, HW)
    w2d = w.reshape(C_out, C_in).astype(jnp.float32)

    scale = bn_gamma.astype(jnp.float32) / jnp.sqrt(bn_var.astype(jnp.float32) + eps)
    # Fold BN scale and the 1/HW mean factor into the weight; pass as (C_in, C_out).
    w_folded = (w2d * scale[:, None] / float(HW)).T                     # (C_in, C_out)
    bias = (bn_beta.astype(jnp.float32)
            - bn_mean.astype(jnp.float32) * scale).reshape(1, C_out)    # (1, C_out)

    elem_bytes = x.dtype.itemsize
    TB, thw, n_hw = _choose_tiles(N, C_in, HW, elem_bytes)
    ragged = (HW % thw) != 0

    # VMEM budget from the actual block footprint.
    x_bufs = 3 if n_hw > 1 else 2
    block_bytes = (
        x_bufs * TB * C_in * thw * elem_bytes       # x blocks
        + (C_in * C_out + C_out) * 4                # weight + bias (single buffer)
        + 2 * TB * C_out * elem_bytes               # output block
        + TB * C_in * 4                             # f32 accumulator scratch
    )
    vmem_limit = int(min(_VMEM_CAP, max(16 << 20, block_bytes + (4 << 20))))

    # Deeper x buffering only when HW is tiled (many-row strided copies).
    x_spec_kwargs = {"pipeline_mode": pl.Buffered(3)} if n_hw > 1 else {}

    kernel = functools.partial(_gap_conv1x1_kernel,
                               hw_total=HW, thw=thw, ragged=ragged)

    pooled_out = pl.pallas_call(
        kernel,
        out_shape=jax.ShapeDtypeStruct((N, C_out), x_nchw.dtype),
        grid_spec=pltpu.PrefetchScalarGridSpec(
            num_scalar_prefetch=0,
            grid=(pl.cdiv(N, TB), n_hw),
            in_specs=[
                pl.BlockSpec((TB, C_in, thw), lambda b, h: (b, 0, h),
                             **x_spec_kwargs),
                # Constant blocks: single-buffered (no wasted 2nd VMEM copy).
                pl.BlockSpec((C_in, C_out), lambda b, h: (0, 0),
                             pipeline_mode=pl.Buffered(1)),
                pl.BlockSpec((1, C_out), lambda b, h: (0, 0),
                             pipeline_mode=pl.Buffered(1)),
            ],
            out_specs=pl.BlockSpec((TB, C_out), lambda b, h: (b, 0)),
            scratch_shapes=[pltpu.VMEM((TB, C_in), jnp.float32)],
        ),
        compiler_params=pltpu.CompilerParams(
            dimension_semantics=("parallel", "arbitrary"),
            vmem_limit_bytes=vmem_limit,
        ),
    )(x, w_folded, bias)

    # Bilinear upsample from a 1x1 source == exact broadcast (any align_corners).
    # Done outside the kernel so XLA can fuse the replication into the consumer.
    return jnp.broadcast_to(pooled_out[:, :, None, None], (N, C_out, H, W))


if __name__ == "__main__":
    key = jax.random.PRNGKey(0)
    N, C_in, C_out, H, W = 2, 4, 8, 16, 16

    k_x, k_w, k_g, k_b, k_m, k_v = jax.random.split(key, 6)
    x = jax.random.normal(k_x, (N, C_in, H, W), dtype=jnp.float32)

    # deterministic synthetic parameters (BatchNorm in eval mode)
    w = jax.random.normal(k_w, (C_out, C_in, 1, 1), dtype=jnp.float32) * 0.1
    bn_gamma = 1.0 + 0.1 * jax.random.normal(k_g, (C_out,), dtype=jnp.float32)
    bn_beta = 0.1 * jax.random.normal(k_b, (C_out,), dtype=jnp.float32)
    bn_mean = 0.1 * jax.random.normal(k_m, (C_out,), dtype=jnp.float32)
    bn_var = jnp.abs(jax.random.normal(k_v, (C_out,), dtype=jnp.float32)) + 0.5

    out = gap_conv1x1(x, w, bn_gamma, bn_beta, bn_mean, bn_var)
    jax.block_until_ready(out)

    # pure-JAX reference (matches the PyTorch module in eval mode)
    pooled = x.mean(axis=(2, 3), keepdims=True)                         # (N,C_in,1,1)
    conv = jnp.einsum("ncij,ocij->noij", pooled, w)                     # (N,C_out,1,1)
    bn = (conv - bn_mean[None, :, None, None]) / jnp.sqrt(
        bn_var[None, :, None, None] + 1e-5)
    bn = bn * bn_gamma[None, :, None, None] + bn_beta[None, :, None, None]
    ref = jnp.broadcast_to(jnp.maximum(bn, 0.0), (N, C_out, H, W))
    assert jnp.allclose(out, ref, atol=1e-5, rtol=1e-5), "mismatch vs reference"

    print("KERNEL_OK")
</pallas_src>

<mosaic_0001>
module attributes {stable_mosaic.version = 11 : i64} {
  func.func @_gap_conv1x1_kernel(%arg0: i32, %arg1: i32, %arg2: memref<2x4x256xf32, #tpu.memory_space<vmem>>, %arg3: memref<4x8xf32, #tpu.memory_space<vmem>>, %arg4: memref<1x8xf32, #tpu.memory_space<vmem>>, %arg5: memref<2x8xf32, #tpu.memory_space<vmem>>, %arg6: memref<2x4xf32, #tpu.memory_space<vmem>>) attributes {dimension_semantics = [#tpu.dimension_semantics<parallel>, #tpu.dimension_semantics<arbitrary>], iteration_bounds = array<i64: 1, 1>, scalar_prefetch = 0 : i64, scratch_operands = 1 : i64, tpu.core_type = #tpu.core_type<tc>, window_params = [{transform_indices = @transform_0, window_bounds = array<i64: 2, 4, 256>}, {pipeline_mode = #tpu.pipeline_mode<synchronous>, transform_indices = @transform_1, window_bounds = array<i64: 4, 8>}, {pipeline_mode = #tpu.pipeline_mode<synchronous>, transform_indices = @transform_2, window_bounds = array<i64: 1, 8>}, {transform_indices = @transform_3, window_bounds = array<i64: 2, 8>}]} {
    %c0_i32 = arith.constant 0 : i32
    %0 = arith.cmpi eq, %arg1, %c0_i32 : i32
    %1 = arith.extui %0 : i1 to i32
    %c0_i32_0 = arith.constant 0 : i32
    %2 = arith.cmpi ne, %1, %c0_i32_0 : i32
    scf.if %2 {
      %cst_9 = arith.constant 0.000000e+00 : f32
      %11 = vector.broadcast %cst_9 : f32 to vector<2x4xf32>
      %c0_10 = arith.constant 0 : index
      %c0_11 = arith.constant 0 : index
      %12 = vector.load %arg6[%c0_10, %c0_11] : memref<2x4xf32, #tpu.memory_space<vmem>>, vector<2x4xf32>
      tpu.vector_store %arg6[%c0_10, %c0_11], %11 {strides = array<i32>} : memref<2x4xf32, #tpu.memory_space<vmem>>, vector<2x4xf32>,
    } else {
    }
    %c0 = arith.constant 0 : index
    %c0_1 = arith.constant 0 : index
    %c0_2 = arith.constant 0 : index
    %3 = vector.load %arg2[%c0, %c0_1, %c0_2] : memref<2x4x256xf32, #tpu.memory_space<vmem>>, vector<2x4x256xf32>
    %c0_3 = arith.constant 0 : index
    %c0_4 = arith.constant 0 : index
    %4 = vector.load %arg6[%c0_3, %c0_4] : memref<2x4xf32, #tpu.memory_space<vmem>>, vector<2x4xf32>
    %cst = arith.constant dense<0.000000e+00> : vector<2x4xf32>
    %5 = vector.multi_reduction <add>, %3, %cst [2] : vector<2x4x256xf32> to vector<2x4xf32>
    %6 = arith.addf %4, %5 : vector<2x4xf32>
    %c0_5 = arith.constant 0 : index
    %c0_6 = arith.constant 0 : index
    %7 = vector.load %arg6[%c0_5, %c0_6] : memref<2x4xf32, #tpu.memory_space<vmem>>, vector<2x4xf32>
    tpu.vector_store %arg6[%c0_5, %c0_6], %6 {strides = array<i32>} : memref<2x4xf32, #tpu.memory_space<vmem>>, vector<2x4xf32>,
    %c0_i32_7 = arith.constant 0 : i32
    %8 = arith.cmpi eq, %arg1, %c0_i32_7 : i32
    %9 = arith.extui %8 : i1 to i32
    %c0_i32_8 = arith.constant 0 : i32
    %10 = arith.cmpi ne, %9, %c0_i32_8 : i32
    scf.if %10 {
      %c0_9 = arith.constant 0 : index
      %c0_10 = arith.constant 0 : index
      %11 = vector.load %arg6[%c0_9, %c0_10] : memref<2x4xf32, #tpu.memory_space<vmem>>, vector<2x4xf32>
      %c0_11 = arith.constant 0 : index
      %c0_12 = arith.constant 0 : index
      %12 = vector.load %arg3[%c0_11, %c0_12] : memref<4x8xf32, #tpu.memory_space<vmem>>, vector<4x8xf32>
      %cst_13 = arith.constant dense<0.000000e+00> : vector<2x8xf32>
      %13 = tpu.matmul %11, %12, %cst_13 {dimension_numbers = #tpu.dot_dimension_numbers<[1], [0], [0], [1], [0, 0, 1, 1], [], []>} : vector<2x4xf32>, vector<4x8xf32>, vector<2x8xf32> -> vector<2x8xf32>
      %c0_14 = arith.constant 0 : index
      %c0_15 = arith.constant 0 : index
      %14 = vector.load %arg4[%c0_14, %c0_15] : memref<1x8xf32, #tpu.memory_space<vmem>>, vector<1x8xf32>
      %15 = vector.broadcast %14 : vector<1x8xf32> to vector<2x8xf32>
      %16 = arith.addf %13, %15 : vector<2x8xf32>
      %cst_16 = arith.constant 0.000000e+00 : f32
      %17 = vector.broadcast %cst_16 : f32 to vector<2x8xf32>
      %18 = arith.maximumf %16, %17 : vector<2x8xf32>
      %c0_17 = arith.constant 0 : index
      %c0_18 = arith.constant 0 : index
      %19 = vector.load %arg5[%c0_17, %c0_18] : memref<2x8xf32, #tpu.memory_space<vmem>>, vector<2x8xf32>
      tpu.vector_store %arg5[%c0_17, %c0_18], %18 {strides = array<i32>} : memref<2x8xf32, #tpu.memory_space<vmem>>, vector<2x8xf32>,
    } else {
    }
    return
  }
  func.func @transform_0(%arg0: i32, %arg1: i32) -> (i32, i32, i32) {
    %c0_i32 = arith.constant 0 : i32
    %c0_i32_0 = arith.constant 0 : i32
    return %arg0, %c0_i32, %arg1 : i32, i32, i32
  }
  func.func @transform_1(%arg0: i32, %arg1: i32) -> (i32, i32) {
    %c0_i32 = arith.constant 0 : i32
    %c0_i32_0 = arith.constant 0 : i32
    %c0_i32_1 = arith.constant 0 : i32
    return %c0_i32, %c0_i32_0 : i32, i32
  }
  func.func @transform_2(%arg0: i32, %arg1: i32) -> (i32, i32) {
    %c0_i32 = arith.constant 0 : i32
    %c0_i32_0 = arith.constant 0 : i32
    %c0_i32_1 = arith.constant 0 : i32
    return %c0_i32, %c0_i32_0 : i32, i32
  }
  func.func @transform_3(%arg0: i32, %arg1: i32) -> (i32, i32) {
    %c0_i32 = arith.constant 0 : i32
    %c0_i32_0 = arith.constant 0 : i32
    return %arg0, %c0_i32 : i32, i32
  }
}

</mosaic_0001>

<bundles_post_ra>
// kernel: tpu_custom_call.1
= control target key start
LH: loop header
LB: loop body
LE: loop exit
PB: predicated region body
PF: predicated region fallthrough
CT: control target
= control target key end

     0   :  { %8 = vsyncpa [#allocation4], 0  ;;  %s357_s0 = inlined_call_operand.hbm [shape: f32[2,4,256], index: 0, kind: input, shape index: {}]   ;;  %s358_s1 = inlined_call_operand.hbm [shape: f32[4,8], index: 1, kind: input, shape index: {}]   ;;  %s359_s2 = inlined_call_operand.vmem [shape: f32[1,8], index: 2, kind: input, shape index: {}]   ;;  %s360_s3 = inlined_call_operand.hbm [shape: f32[2,8], index: 3, kind: output, shape index: {}]  }
   0x1   :  { %9 = vsyncpa [#allocation7], 0 }
   0x2   :  { %10 = vsyncpa [#allocation5], 0  ;;  %s284_s12 = smov [#allocation3]   ;;  %s212_s16 = scalar_lea.hbm %s357_s0, 256 }
   0x3   :  { %s16_s13 = sshll.u32 %s284_s12, 4  ;;  %p213_p0 = scmp.ne.s32.totalorder %s357_s0, %s212_s16  ;;  %s17_s13 = int_to_ptr.vmem [resolvable:$true] %s16_s13 }
   0x4   :  { %p216_p1 = scmp.lt.u32.totalorder %s212_s16, %s357_s0 }
   0x6   :  { %p218_p2 = pnand %p216_p1, %p213_p0 }
   0x8   :  { %221 = shalt.err (!%p218_p2)
}
   0x9   :  { %s222_s21 = scalar_lea.vmem %s17_s13, 256  ;;  %p227_p4 = scmp.lt.s32.totalorder %s17_s13, %s17_s13 }
   0xa   :  { %p223_p3 = scmp.ne.s32.totalorder %s17_s13, %s222_s21  ;;  %p228_p5 = scmp.lt.s32.totalorder %s222_s21, %s222_s21 }
   0xc   :  { %p229_p6 = por %p228_p5, %p227_p4 }
   0xe   :  { %p230_p7 = pnand %p229_p6, %p223_p3 }
  0x10   :  { %233 = shalt.err (!%p230_p7)
}
  0x11   :  { %s285_s22 = smov 128   ;;  %s286_s23 = smov 8  }
  0x12   :  { %22 = dma.hbm_to_vmem [thread:$0]  %s357_s0, 256, %s17_s13, [#allocation4], %s285_s22, %s285_s22, %s286_s23  }
  0x13   :  { %s287_s26 = smov [#allocation6]   ;;  %s234_s30 = scalar_lea.hbm %s358_s1, 64 }
  0x14   :  { %s29_s27 = sshll.u32 %s287_s26, 4  ;;  %p235_p8 = scmp.ne.s32.totalorder %s358_s1, %s234_s30  ;;  %s30_s27 = int_to_ptr.vmem [resolvable:$true] %s29_s27 }
  0x15   :  { %p238_p9 = scmp.lt.u32.totalorder %s234_s30, %s358_s1 }
  0x17   :  { %p240_p10 = pnand %p238_p9, %p235_p8 }
  0x19   :  { %243 = shalt.err (!%p240_p10)
}
  0x1a   :  { %s244_s8 = scalar_lea.vmem %s30_s27, 64  ;;  %p249_p12 = scmp.lt.s32.totalorder %s30_s27, %s30_s27 }
  0x1b   :  { %p245_p11 = scmp.ne.s32.totalorder %s30_s27, %s244_s8  ;;  %p250_p13 = scmp.lt.s32.totalorder %s244_s8, %s244_s8 }
  0x1d   :  { %p251_p0 = por %p250_p13, %p249_p12 }
  0x1f   :  { %p252_p1 = pnand %p251_p0, %p245_p11 }
  0x21   :  { %255 = shalt.err (!%p252_p1)
}
  0x22   :  { %32 = dma.hbm_to_vmem [thread:$0]  %s358_s1, 64, %s30_s27, [#allocation7]  }
  0x23   :  { %278 = dma.done.wait [#allocation4], 256  }
  0x24   :  { %279 = vsyncadd [#allocation4], 4294967040 }
  0x25   :  { %280 = dma.done.wait [#allocation7], 64  }
  0x26   :  { %281 = vsyncadd [#allocation7], 4294967232  ;;  %vm56_vm0 = vcmask 1043456   ;;  %v47_v0 = vld [vmem:[#allocation3] sm:$0xff]  ;;  %v48_v1 = vld [vmem:[#allocation3 + $0x8] sm:$0xff]  ;;  %vm45_vm1 = vcmask 25600   ;;  %v69_v12 = vlaneseq }
  0x27   :  { %v52_v2 = vcombine.high %v47_v0, %v47_v0  ;;  %v57_v3 = vsel %vm56_vm0, %v47_v0, 0.0  ;;  %v53_v4 = vcombine.high %v48_v1, %v48_v1  ;;  %v62_v6 = vsel %vm56_vm0, %v48_v1, 0.0  ;;  %v89_v11 = vld [vmem:[#allocation6] sm:$0xf]  ;;  %v193_v24 = vld [vmem:[%s359_s2] ss:$0 sm:$0xff] }
  0x28   :  { %v288_v10 = vmov 0.0   ;;  %vm289_vm2 = vmmov 0   ;;  %v70_v13 = vand.u32 127, %v69_v12  ;;  %v72_v14 = vshrl.u32 %v69_v12, 7  ;;  %s290_s11 = smov [#allocation8]  }
  0x29   :  { %v58_v5 = vsel %vm56_vm0, %v52_v2, 0.0  ;;  %v63_v7 = vsel %vm56_vm0, %v53_v4, 0.0  ;;  %46 = vst.msk [vmem:[#allocation2] sm:$0x3] %vm45_vm1, %v288_v10  ;;  %198 = vmatprep.subr.mxu0 %v288_v10  ;;  %200 = vmatprep.mubr.msk.f32.mxu0 %vm289_vm2, %v288_v10  ;;  %vm79_vm3 = vcmask 1041409   ;;  %vm97_vm4 = vcmask 31744  }
  0x2a   :  { %v59_v8 = vadd.f32 %v58_v5, %v57_v3  ;;  %v64_v9 = vadd.f32 %v63_v7, %v62_v6  ;;  %199 = vmatpush3.msk.msra.mxu0 %vm56_vm0, %v89_v11  ;;  %v73_v16 = vsub.s32 %v70_v13, %v72_v14  ;;  %s183_s12 = sshll.u32 %s290_s11, 4  ;;  %vm175_vm5 = vcmask 58368   ;;  %s184_s12 = int_to_ptr.vmem [resolvable:$true] %s183_s12 }
  0x2b   :  { %s256_s13 = scalar_lea.vmem %s184_s12, 32  ;;  %p261_p3 = scmp.lt.s32.totalorder %s184_s12, %s184_s12 }
  0x2c   :  { %60 = vadd.xlane.f32.xlu0 %v59_v8  ;;  %p257_p2 = scmp.ne.s32.totalorder %s184_s12, %s256_s13  ;;  %p262_p4 = scmp.lt.s32.totalorder %s256_s13, %s256_s13 }
  0x2e   :  { %p263_p5 = por %p262_p4, %p261_p3 }
  0x30   :  { %65 = vadd.xlane.f32.xlu0 %v64_v9  ;;  %v49_v20 = vld [vmem:[#allocation2] sm:$0x3]  ;;  %p264_p6 = pnand %p263_p5, %p257_p2 }
  0xb9   :  { %v61_v15 = vpop.xlane.xlu0 %60 }
  0xba   :  { %v74_v18 = vrot.slane %v61_v15, %v73_v16 }
  0xbd   :  { %v66_v17 = vpop.xlane.xlu0 %65 }
  0xbe   :  { %v78_v19 = vrot.slane %v66_v17, %v73_v16 }
  0xc0   :  { %v80_v21 = vsel %vm79_vm3, %v78_v19, %v74_v18 }
  0xc1   :  { %v82_v22 = vadd.f32 %v80_v21, %v49_v20 }
  0xc3   :  { %84 = vst.msk [vmem:[#allocation2] sm:$0x3] %vm45_vm1, %v82_v22 }
  0xca   :  { %v88_v23 = vld [vmem:[#allocation2] sm:$0x3] }
  0xcb   :  { %201 = vmatmul.mubr.msk.f32.vlgmr.msra.gmra.mrb[0].mxu0 %vm97_vm4, %v88_v23 }
 0x19e   :  { %v170_v25 = vpop.f32.mrb[0].mxu0 }
 0x19f   :  { %v171_v26 = vadd.f32 %v193_v24, %v170_v25  ;;  %v202_v27 = vpop.f32.mrb[1].mxu0 }
 0x1a1   :  { %v174_v28 = vmax.f32 %v171_v26, 0.0 }
 0x1a3   :  { %176 = vst.msk [vmem:[#allocation8] sm:$0x3] %vm175_vm5, %v174_v28 }
 0x1a4   :  { %267 = shalt.err (!%p264_p6)
}
 0x1a5   :  { %s268_s2 = scalar_lea.hbm %s360_s3, 32 }
 0x1a6   :  { %p269_p7 = scmp.ne.s32.totalorder %s360_s3, %s268_s2  ;;  %p272_p8 = scmp.lt.u32.totalorder %s268_s2, %s360_s3 }
 0x1a8   :  { %p274_p9 = pnand %p272_p8, %p269_p7 }
 0x1aa   :  { %277 = shalt.err (!%p274_p9)
}
 0x1ab   :  { %186 = dma.vmem_to_hbm [thread:$0]  %s184_s12, 32, %s360_s3, [#allocation5]  }
 0x1ac   :  { %282 = dma.done.wait [#allocation5], 32  }
 0x1ad   :  { %283 = vsyncadd [#allocation5], 4294967264 }
 0x1ae   :  { %190 = vsyncpa [#allocation4], 1 }
 0x1af   :  { %191 = vsyncpa [#allocation7], 1 }
 0x1b0   :  { %192 = vsyncpa [#allocation5], 1 }

</bundles_post_ra>
